<compile_context>
chip_gen: v5e
topology: v5e:2x2
jax: 0.10.0
libtpu: 0.0.40
codegen_flags: <defaults>
</compile_context>

<pallas_src>
import functools

import jax
import jax.numpy as jnp
from jax.experimental import pallas as pl
from jax.experimental.pallas import tpu as pltpu


def _layernorm_kernel(x_ref, g_ref, o_ref, *, eps, inv_c):
    # x_ref: (1, C, T); g_ref: (1, C, 1); o_ref: (1, C, T)
    x = x_ref[...].astype(jnp.float32)
    g = g_ref[...].astype(jnp.float32)            # cast once per step

    # One-pass biased statistics over the channel (sublane) axis.
    s = jnp.sum(x, axis=1, keepdims=True)         # (1, 1, T)
    ss = jnp.sum(x * x, axis=1, keepdims=True)    # (1, 1, T)
    mean = s * inv_c
    var = ss * inv_c - mean * mean                # unbiased=False
    inv = jax.lax.rsqrt(var + eps)

    o_ref[...] = ((x - mean) * inv * g).astype(o_ref.dtype)


def _pick_spatial_tile(hw, c, itemsize):
    """Largest 128-multiple tile dividing hw that fits a conservative VMEM budget.

    Footprint estimate per grid step: double-buffered input + output blocks
    (C*T*itemsize each, x2 buffers each) plus ~2 f32 temps of shape (C, T).
    Budget is kept well under the default scoped-VMEM limit on all generations
    (v5e 16 MiB default, v6e/v7x 32 MiB default; we also raise the limit).
    """
    budget = 12 << 20
    candidates = [t for t in (2048, 1024, 512, 256, 128)
                  if t <= hw and hw % t == 0]
    for t in candidates:
        if c * t * (4 * itemsize + 2 * 4) <= budget:
            return t
    if candidates:
        return candidates[-1]   # smallest 128-multiple divisor
    return hw                   # full dim: block == array dim is always legal


def layer_norm(x, g):
    """x: (N, C, H, W), g: (1, C, 1, 1) — matches the PyTorch module."""
    N, C, H, W = x.shape
    HW = H * W
    eps = 1e-05 if x.dtype == jnp.float32 else 1e-03

    x2 = x.reshape(N, C, HW)        # free reshape (contiguous)
    g2 = g.reshape(1, C, 1)

    T = _pick_spatial_tile(HW, C, jnp.dtype(x.dtype).itemsize)
    n_tiles = HW // T               # T divides HW or T == HW

    kernel = functools.partial(_layernorm_kernel, eps=eps, inv_c=1.0 / C)

    out = pl.pallas_call(
        kernel,
        out_shape=jax.ShapeDtypeStruct((N, C, HW), x.dtype),
        grid_spec=pltpu.PrefetchScalarGridSpec(
            num_scalar_prefetch=0,
            grid=(N, n_tiles),
            in_specs=[
                # x: tile spatial axis; reduction axis C stays whole in-block.
                pl.BlockSpec((1, C, T), lambda n, t: (n, 0, t)),
                # g: constant block — pipeline keeps it resident (no refetch).
                pl.BlockSpec((1, C, 1), lambda n, t: (0, 0, 0)),
            ],
            out_specs=pl.BlockSpec((1, C, T), lambda n, t: (n, 0, t)),
        ),
        compiler_params=pltpu.CompilerParams(
            # Both axes independent -> shard across TensorCores (v7x megacore).
            dimension_semantics=("parallel", "parallel"),
            vmem_limit_bytes=32 << 20,
        ),
    )(x2, g2)
    return out.reshape(N, C, H, W)


if __name__ == "__main__":
    key = jax.random.PRNGKey(0)
    N, C, H, W = 2, 4, 16, 16
    x = jax.random.normal(key, (N, C, H, W), dtype=jnp.float32)
    # nn.Parameter(torch.ones(1, dim, 1, 1)) — deterministic init.
    g = jnp.ones((1, C, 1, 1), dtype=jnp.float32)

    out = layer_norm(x, g)
    out = jax.block_until_ready(out)

    # Reference check in plain JAX (same semantics as the torch module).
    eps = 1e-05
    mean = jnp.mean(x, axis=1, keepdims=True)
    var = jnp.mean((x - mean) ** 2, axis=1, keepdims=True)
    ref = (x - mean) * jax.lax.rsqrt(var + eps) * g
    assert jnp.allclose(out, ref, atol=1e-5, rtol=1e-5)

    print("KERNEL_OK")
</pallas_src>

<mosaic_0001>
module attributes {stable_mosaic.version = 11 : i64} {
  func.func @_layernorm_kernel(%arg0: i32, %arg1: i32, %arg2: memref<1x4x256xf32, #tpu.memory_space<vmem>>, %arg3: memref<1x4x1xf32, #tpu.memory_space<vmem>>, %arg4: memref<1x4x256xf32, #tpu.memory_space<vmem>>) attributes {dimension_semantics = [#tpu.dimension_semantics<parallel>, #tpu.dimension_semantics<parallel>], iteration_bounds = array<i64: 2, 1>, scalar_prefetch = 0 : i64, scratch_operands = 0 : i64, tpu.core_type = #tpu.core_type<tc>, window_params = [{transform_indices = @transform_0, window_bounds = array<i64: 1, 4, 256>}, {pipeline_mode = #tpu.pipeline_mode<synchronous>, transform_indices = @transform_1, window_bounds = array<i64: 1, 4, 1>}, {transform_indices = @transform_2, window_bounds = array<i64: 1, 4, 256>}]} {
    %c0 = arith.constant 0 : index
    %c0_0 = arith.constant 0 : index
    %c0_1 = arith.constant 0 : index
    %0 = vector.load %arg2[%c0, %c0_0, %c0_1] : memref<1x4x256xf32, #tpu.memory_space<vmem>>, vector<1x4x256xf32>
    %c0_2 = arith.constant 0 : index
    %c0_3 = arith.constant 0 : index
    %c0_4 = arith.constant 0 : index
    %1 = vector.load %arg3[%c0_2, %c0_3, %c0_4] : memref<1x4x1xf32, #tpu.memory_space<vmem>>, vector<1x4x1xf32>
    %cst = arith.constant dense<0.000000e+00> : vector<1x256xf32>
    %2 = vector.multi_reduction <add>, %0, %cst [1] : vector<1x4x256xf32> to vector<1x256xf32>
    %3 = vector.shape_cast %2 : vector<1x256xf32> to vector<1x1x256xf32>
    %4 = arith.mulf %0, %0 : vector<1x4x256xf32>
    %cst_5 = arith.constant dense<0.000000e+00> : vector<1x256xf32>
    %5 = vector.multi_reduction <add>, %4, %cst_5 [1] : vector<1x4x256xf32> to vector<1x256xf32>
    %6 = vector.shape_cast %5 : vector<1x256xf32> to vector<1x1x256xf32>
    %cst_6 = arith.constant 2.500000e-01 : f32
    %7 = vector.broadcast %cst_6 : f32 to vector<1x1x256xf32>
    %8 = arith.mulf %3, %7 : vector<1x1x256xf32>
    %cst_7 = arith.constant 2.500000e-01 : f32
    %9 = vector.broadcast %cst_7 : f32 to vector<1x1x256xf32>
    %10 = arith.mulf %6, %9 : vector<1x1x256xf32>
    %11 = arith.mulf %8, %8 : vector<1x1x256xf32>
    %12 = arith.subf %10, %11 : vector<1x1x256xf32>
    %cst_8 = arith.constant 9.99999974E-6 : f32
    %13 = vector.broadcast %cst_8 : f32 to vector<1x1x256xf32>
    %14 = arith.addf %12, %13 : vector<1x1x256xf32>
    %15 = math.rsqrt %14 : vector<1x1x256xf32>
    %16 = vector.broadcast %8 : vector<1x1x256xf32> to vector<1x4x256xf32>
    %17 = arith.subf %0, %16 : vector<1x4x256xf32>
    %18 = vector.broadcast %15 : vector<1x1x256xf32> to vector<1x4x256xf32>
    %19 = arith.mulf %17, %18 : vector<1x4x256xf32>
    %20 = vector.broadcast %1 : vector<1x4x1xf32> to vector<1x4x256xf32>
    %21 = arith.mulf %19, %20 : vector<1x4x256xf32>
    %c0_9 = arith.constant 0 : index
    %c0_10 = arith.constant 0 : index
    %c0_11 = arith.constant 0 : index
    %22 = vector.load %arg4[%c0_9, %c0_10, %c0_11] : memref<1x4x256xf32, #tpu.memory_space<vmem>>, vector<1x4x256xf32>
    tpu.vector_store %arg4[%c0_9, %c0_10, %c0_11], %21 {strides = array<i32>} : memref<1x4x256xf32, #tpu.memory_space<vmem>>, vector<1x4x256xf32>,
    return
  }
  func.func @transform_0(%arg0: i32, %arg1: i32) -> (i32, i32, i32) {
    %c0_i32 = arith.constant 0 : i32
    %c0_i32_0 = arith.constant 0 : i32
    return %arg0, %c0_i32, %arg1 : i32, i32, i32
  }
  func.func @transform_1(%arg0: i32, %arg1: i32) -> (i32, i32, i32) {
    %c0_i32 = arith.constant 0 : i32
    %c0_i32_0 = arith.constant 0 : i32
    %c0_i32_1 = arith.constant 0 : i32
    %c0_i32_2 = arith.constant 0 : i32
    return %c0_i32, %c0_i32_0, %c0_i32_1 : i32, i32, i32
  }
  func.func @transform_2(%arg0: i32, %arg1: i32) -> (i32, i32, i32) {
    %c0_i32 = arith.constant 0 : i32
    %c0_i32_0 = arith.constant 0 : i32
    return %arg0, %c0_i32, %arg1 : i32, i32, i32
  }
}

</mosaic_0001>

<bundles_post_ra>
// kernel: tpu_custom_call.1
= control target key start
LH: loop header
LB: loop body
LE: loop exit
PB: predicated region body
PF: predicated region fallthrough
CT: control target
= control target key end

     0   :  { %7 = vsyncpa [#allocation3], 0  ;;  %s738_s0 = inlined_call_operand.hbm [shape: f32[2,4,256], index: 0, kind: input, shape index: {}]   ;;  %s739_s1 = inlined_call_operand.vmem [shape: f32[1,4,1], index: 1, kind: input, shape index: {}]   ;;  %s740_s2 = inlined_call_operand.hbm [shape: f32[2,4,256], index: 2, kind: output, shape index: {}]  }
   0x1   :  { %9 = vsyncpa [#allocation3 + $0x1], 0 }
   0x2   :  { %10 = vsyncpa [#allocation4], 0 }
   0x3   :  { %12 = vsyncpa [#allocation4 + $0x1], 0  ;;  %s599_s9 = smov 0   ;;  %s601_s10 = smov 0  }
   0x4   :  { %s603_s11 = smov 0   ;;  %s605_s12 = smov 0  }
   0x5   :  { %s607_s13 = smov 0   ;;  %s609_s14 = smov 0  }
   0x6 LB: > { %s382_s15 = sadd.s32 4294967295, %s580_s14   ;;  %s383_s16 = sadd.s32 4294967294, %s580_s14   ;;  %s580_s14 = sphi %s609_s14, %s18_s14   ;;  %s576_s13 = sphi %s607_s13, %s749_s13   ;;  %s572_s12 = sphi %s605_s12, %s748_s12   ;;  %s568_s11 = sphi %s603_s11, %s747_s11   ;;  %s564_s10 = sphi %s601_s10, %s746_s10   ;;  %s560_s9 = sphi %s599_s9, %s745_s9  }
   0x7   : > { %s30_s17 = sadd.s32 1, %s576_s13  ;;  %s39_s18 = sadd.s32 1, %s568_s11 }
   0x8   : > { %p32_p0 = scmp.ge.s32.totalorder %s30_s17, 2  ;;  %p46_p1 = scmp.ne.s32.totalorder %s568_s11, %s564_s10 }
   0x9   : > { %p47_p2 = scmp.eq.s32.totalorder %s580_s14, 0  ;;  %p52_p3 = scmp.ne.s32.totalorder %s564_s10, %s560_s9 }
   0xa   : > { %s751_s17 = smov (%p32_p0, %s30_s17), 0  ;;  %p53_p5 = scmp.eq.s32.totalorder %s382_s15, 0 }
   0xb   : > { %p640_p4 = por %p47_p2, %p46_p1  ;;  %s34_s20 = ssub.s32 %s576_s13, %s751_s17 }
   0xc   : > { %p99_p6 = scmp.eq.s32.totalorder %s382_s15, 1  ;;  %p37_p7 = scmp.eq.s32.totalorder %s34_s20, 0 }
   0xd   : > { %p646_p8 = por %p53_p5, %p52_p3  ;;  %p105_p10 = scmp.eq.s32.totalorder %s383_s16, 1 }
   0xe   : > { %p650_p9 = por %p99_p6, %p46_p1  ;;  %p385_p12 = scmp.ge.s32.totalorder %s580_s14, 2 }
   0xf   : > { %s655_s23 = scalar_select %p37_p7, %s568_s11, %s39_s18  }
  0x10   : > { %p657_p11 = por %p105_p10, %p52_p3  ;;  %p411_p13 = scmp.lt.s32.totalorder %s580_s14, 2 }
  0x11   : > { %s128_s25 = sand.u32 1, %s568_s11   ;;  %s397_s27 = sshll.u32 %s576_s13, 3 }
  0x12   : > { %s386_s26 = sshll.u32 %s128_s25, 3  ;;  %s139_s30 = scalar_lea.hbm %s738_s0, %s397_s27 }
  0x13   : > { %s132_s3 = scalar_lea.vmem [#allocation2], %s386_s26  ;;  %s141_s5 = sshll.u32 %s139_s30, 4  ;;  %s142_s5 = int_to_ptr.hbm [resolvable:$true] %s141_s5 }
  0x14   : > { %s143_s4 = sshll.u32 %s132_s3, 4  ;;  %p404_p0 = pnand %p411_p13, %p640_p4  ;;  %s144_s4 = int_to_ptr.vmem [resolvable:$true] %s143_s4 }
  0x15   : > { %p389_p1 = scmp.ge.s32.totalorder %s580_s14, 1  ;;  %p148_p2 = scmp.lt.s32.totalorder %s580_s14, 3 }
  0x16   : > { %s129_s6 = scalar_lea.sflag [#allocation3], %s128_s25 }
  0x17   : > { %406 = dma.hbm_to_vmem [thread:$0]  (!%p404_p0), %s142_s5, 128, %s144_s4, %s129_s6  }
  0x18   : > { %p149_p3 = pnand %p389_p1, %p148_p2 }
  0x19   : > { %s673_s7 = sand.u32 (!%p149_p3), 1, %s564_s10  }
  0x1a   : > { %152 = sbr.rel (%p149_p3) target bundleno = 156 (0x9c), region = 28  ;;  %s390_s8 = sshll.u32 (!%p149_p3), %s673_s7, 3 }
  0x1b   : > { %s155_s15 = scalar_lea.sflag (!%p149_p3), [#allocation3], %s673_s7  ;;  %s158_s16 = scalar_lea.vmem (!%p149_p3), [#allocation2], %s390_s8 }
  0x1f   : > { %551 = dma.done.wait (%p646_p8), %s155_s15, 128  }
  0x20   : > { %553 = vsyncadd (%p646_p8), %s155_s15, 4294967168  ;;  %v582_v0 = vmov 0   ;;  %v183_v1 = vld [vmem:[%s739_s1] sm:$0xf]  ;;  %v686_v2 = vld [vmem:[%s158_s16] sm:$0xff]  ;;  %vm190_vm0 = vcmask 1043456  }
  0x21   : > { %463 = vset.pattern.permute.xlu0 %v582_v0  ;;  %185 = vst [vmem:[#allocation1] ss:$2 sm:$0xff] %v686_v2  ;;  %v205_v3 = vmul.f32 %v686_v2, %v686_v2  ;;  %v583_v62 = vmov 839922192   ;;  %s398_s20 = sshll.u32 %s572_s12, 3  ;;  %s179_s27 = scalar_lea.vmem [#allocation5], %s390_s8 }
  0x22   : > { %270 = vperm.xlu0 %463, %v183_v1   ;;  %v273_v63 = vunpack.c.l.s4 %v583_v62  ;;  %s293_s26 = scalar_lea.hbm %s740_s2, %s398_s20  ;;  %s295_s28 = sshll.u32 %s179_s27, 4  ;;  %s296_s28 = int_to_ptr.vmem [resolvable:$true] %s295_s28 }
  0x23   : > { %s297_s29 = sshll.u32 %s293_s26, 4  ;;  %s280_s12 = scalar_lea.sflag [#allocation4], %s673_s7  ;;  %s298_s29 = int_to_ptr.hbm [resolvable:$true] %s297_s29 }
  0x24   : > { %s512_s30 = sshra.s32 %s298_s29, 4  ;;  %s518_s6 = scalar_lea.hbm %s740_s2, 16  ;;  %s513_s30 = int_to_ptr.hbm [resolvable:$true] %s512_s30 }
  0x25   : > { %s514_s3 = scalar_lea.hbm %s513_s30, 8  ;;  %p519_p7 = scmp.lt.s32.totalorder %s513_s30, %s740_s2 }
  0x26   : > { %p515_p4 = scmp.ne.s32.totalorder %s513_s30, %s514_s3  ;;  %p520_p8 = scmp.lt.s32.totalorder %s518_s6, %s514_s3 }
  0x28   : > { %v186_v4 = vld.sshfl [vmem:[#allocation1] sm:$0xff pattern:$0x75316420]  ;;  %v187_v5 = vld.sshfl [vmem:[#allocation1 + $0x8] sm:$0xff pattern:$0x75316420]  ;;  %p516_p5 = pnand %p515_p4, %p650_p9  ;;  %p521_p10 = por %p520_p8, %p519_p7 }
  0x29   : > { %207 = vst [vmem:[#allocation1] ss:$2 sm:$0xff] %v205_v3  ;;  %v198_v6 = vsel %vm190_vm0, %v187_v5, 0.0  ;;  %v191_v9 = vsel %vm190_vm0, %v186_v4, 0.0  ;;  %v274_v4 = vunpack.c.0.s8 %v273_v63 }
  0x2a   : > { %v199_v7 = vrot.slane %v198_v6, 4  ;;  %v192_v11 = vrot.slane %v191_v9, 4  ;;  %p517_p6 = pneg %p516_p5 }
  0x2c   : > { %v200_v12 = vadd.f32 %v199_v7, %v198_v6  ;;  %v193_v16 = vadd.f32 %v192_v11, %v191_v9  ;;  %p522_p13 = pnand %p521_p10, %p517_p6 }
  0x2e   : > { %v201_v17 = vrot.slane %v200_v12, 2  ;;  %v194_v20 = vrot.slane %v193_v16, 2 }
  0x30   : > { %v209_v8 = vld.sshfl [vmem:[#allocation1 + $0x8] sm:$0xff pattern:$0x75316420]  ;;  %v208_v13 = vld.sshfl [vmem:[#allocation1] sm:$0xff pattern:$0x75316420]  ;;  %v202_v21 = vadd.f32 %v201_v17, %v200_v12  ;;  %v195_v24 = vadd.f32 %v194_v20, %v193_v16 }
  0x31   : > { %v219_v10 = vsel %vm190_vm0, %v209_v8, 0.0  ;;  %v212_v15 = vsel %vm190_vm0, %v208_v13, 0.0 }
  0x32   : > { %v220_v14 = vrot.slane %v219_v10, 4  ;;  %v213_v18 = vrot.slane %v212_v15, 4  ;;  %v203_v25 = vrot.slane %v202_v21, 1  ;;  %v196_v28 = vrot.slane %v195_v24, 1 }
  0x34   : > { %v221_v19 = vadd.f32 %v220_v14, %v219_v10  ;;  %v214_v22 = vadd.f32 %v213_v18, %v212_v15  ;;  %v204_v29 = vadd.f32 %v203_v25, %v202_v21  ;;  %v197_v32 = vadd.f32 %v196_v28, %v195_v24 }
  0x36   : > { %v222_v23 = vrot.slane %v221_v19, 2  ;;  %v215_v26 = vrot.slane %v214_v22, 2  ;;  %v227_v35 = vmul.f32 0.25, %v204_v29  ;;  %v226_v37 = vmul.f32 0.25, %v197_v32 }
  0x38   : > { %v223_v27 = vadd.f32 %v222_v23, %v221_v19  ;;  %v216_v30 = vadd.f32 %v215_v26, %v214_v22  ;;  %v231_v39 = vmul.f32 %v227_v35, %v227_v35  ;;  %v230_v41 = vmul.f32 %v226_v37, %v226_v37 }
  0x39   : > { %v258_v57 = vrot.slane %v227_v35, 4 }
  0x3a   : > { %v224_v31 = vrot.slane %v223_v27, 1  ;;  %v217_v33 = vrot.slane %v216_v30, 1 }
  0x3b   : > { %v259_v60 = vsel %vm190_vm0, %v226_v37, %v258_v57 }
  0x3c   : > { %v225_v34 = vadd.f32 %v224_v31, %v223_v27  ;;  %v218_v36 = vadd.f32 %v217_v33, %v216_v30  ;;  %v261_v1 = vsub.f32 %v686_v2, %v259_v60 }
  0x3e   : > { %v229_v38 = vmul.f32 0.25, %v225_v34  ;;  %v228_v40 = vmul.f32 0.25, %v218_v36 }
  0x40   : > { %v233_v42 = vsub.f32 %v229_v38, %v231_v39  ;;  %v232_v43 = vsub.f32 %v228_v40, %v230_v41 }
  0x42   : > { %v235_v44 = vadd.f32 1e-05, %v233_v42  ;;  %v234_v45 = vadd.f32 1e-05, %v232_v43 }
  0x44   : > { %464 = vrsqrt.f32 %v235_v44  ;;  %vm252_vm1 = vweird.f32 %v235_v44  ;;  %vm242_vm4 = vweird.f32 %v234_v45 }
  0x45   : > { %466 = vrsqrt.f32 %v234_v45 }
  0x4a   : > { %v465_v46 = vpop.eup %464 }
  0x4b   : > { %v247_v47 = vmul.f32 %v465_v46, %v235_v44  ;;  %v467_v48 = vpop.eup %466  ;;  %vm253_vm2 = vweird.f32 %v465_v46 }
  0x4c   : > { %v237_v49 = vmul.f32 %v467_v48, %v234_v45  ;;  %vm254_vm3 = vmor %vm252_vm1, %vm253_vm2  ;;  %vm243_vm5 = vweird.f32 %v467_v48 }
  0x4d   : > { %v248_v50 = vmul.f32 %v465_v46, %v247_v47  ;;  %vm244_vm6 = vmor %vm242_vm4, %vm243_vm5 }
  0x4e   : > { %v238_v51 = vmul.f32 %v467_v48, %v237_v49 }
  0x4f   : > { %v249_v52 = vmul.f32 0.5, %v248_v50 }
  0x50   : > { %v239_v53 = vmul.f32 0.5, %v238_v51 }
  0x51   : > { %v250_v54 = vsub.f32 1.5, %v249_v52 }
  0x52   : > { %v240_v55 = vsub.f32 1.5, %v239_v53 }
  0x53   : > { %v251_v56 = vmul.f32 %v465_v46, %v250_v54 }
  0x54   : > { %v241_v58 = vmul.f32 %v467_v48, %v240_v55 }
  0x55   : > { %v255_v59 = vsel %vm254_vm3, %v465_v46, %v251_v56 }
  0x56   : > { %v264_v61 = vrot.slane %v255_v59, 4  ;;  %v245_v0 = vsel %vm244_vm6, %v467_v48, %v241_v58 }
  0x58   : > { %v265_v3 = vsel %vm190_vm0, %v245_v0, %v264_v61 }
  0x59   : > { %v267_v5 = vmul.f32 %v265_v3, %v261_v1 }
  0x94   : > { %v271_v6 = vpop.permute.xlu0 %270 }
  0x95   : > { %v275_v7 = vperm.slane %v271_v6, %v274_v4 }
  0x97   : > { %v277_v8 = vmul.f32 %v275_v7, %v267_v5 }
  0x99   : > { %278 = vst [vmem:[%s179_s27] sm:$0xff] %v277_v8 }
  0x9a   : > { %525 = shalt.err (!%p522_p13)
}
  0x9b   : > { %401 = dma.vmem_to_hbm [thread:$0]  (%p650_p9), %s296_s28, 128, %s298_s29, %s280_s12  }
  0x9c PF: > { %s309_s7 = sand.u32 1, %s560_s9   ;;  %p408_p0 = pnand %p385_p12, %p657_p11 }
  0x9d   : > { %s310_s16 = scalar_lea.sflag [#allocation4], %s309_s7 }
  0x9e   : > { %p409_p1 = pneg %p408_p0 }
  0xa0   : > { %555 = dma.done.wait (%p409_p1), %s310_s16, 128  }
  0xa1   : > { %557 = vsyncadd (%p409_p1), %s310_s16, 4294967168  ;;  %s18_s14 = sadd.s32 1, %s580_s14   ;;  %s745_s9 = smov %s564_s10 }
  0xa2   : > { %p15_p2 = scmp.ge.s32.totalorder %s18_s14, 4   ;;  %s746_s10 = smov %s568_s11 }
  0xa3   : > { %s747_s11 = smov %s655_s23  ;;  %s748_s12 = smov %s576_s13 }
  0xa4   : > { %s749_s13 = smov %s751_s17  ;;  %17 = sbr.rel (!%p15_p2) target bundleno = 6 (0x6), region = 73 }
  0xa9   :  { %316 = vsyncpa [#allocation3], 1 }
  0xaa   :  { %318 = vsyncpa [#allocation3 + $0x1], 1 }
  0xab   :  { %319 = vsyncpa [#allocation4], 1 }
  0xac   :  { %321 = vsyncpa [#allocation4 + $0x1], 1 }

</bundles_post_ra>
